<compile_context>
chip_gen: v5e
topology: v5e:2x2
jax: 0.10.0
libtpu: 0.0.40
codegen_flags: <defaults>
</compile_context>

<pallas_src>
import math
from functools import partial

import jax
import jax.numpy as jnp
import numpy as np
from jax import lax
from jax.experimental import pallas as pl
from jax.experimental.pallas import tpu as pltpu

# ---- global_args / network_args (small synthetic configuration) -------------
COORD_H, COORD_W = 16.0, 16.0
IMG_H, IMG_W = 16, 16
BATCH_SIZE = 2
N_CLASSES = 4
XY_LIMIT_FACTOR = 1.0
STD_FACTOR = 0.1
FMAP_CH = 32
OUT_SPLIT = (4, 4, N_CLASSES, 1)
OUT_CH = sum(OUT_SPLIT)            # 4 + 4 + n_classes + 1 = 13
EPSILON = 1e-12                    # lib_util.epsilon


def _leaky(x):
    return jnp.where(x > 0, x, 0.2 * x)


def _softplus(x):
    return jnp.maximum(x, 0.0) + jnp.log1p(jnp.exp(-jnp.abs(x)))


def _softmax(x, axis):
    m = jnp.max(x, axis=axis, keepdims=True)
    e = jnp.exp(x - m)
    return e / jnp.sum(e, axis=axis, keepdims=True)


# ---- net_util surrogates (deterministic, MDOD-style semantics) ---------------
def create_xy_map(h, w):
    ys = (jnp.arange(h, dtype=jnp.float32) + 0.5) / h * COORD_H
    xs = (jnp.arange(w, dtype=jnp.float32) + 0.5) / w * COORD_W
    x_map = jnp.broadcast_to(xs[None, :], (h, w))
    y_map = jnp.broadcast_to(ys[:, None], (h, w))
    return jnp.stack([x_map, y_map], axis=-1)                 # (h, w, 2)


def create_def_coord(h, w):
    xy = create_xy_map(h, w).reshape(-1, 2)                    # cell centers (N, 2)
    wh = jnp.broadcast_to(jnp.array([COORD_W / w, COORD_H / h], jnp.float32), xy.shape)
    return jnp.concatenate([xy, wh], axis=1)                   # (N, 4) = [cx, cy, w, h]


def create_limit_scale(h, w):
    sc = jnp.array([COORD_W / w * XY_LIMIT_FACTOR,
                    COORD_H / h * XY_LIMIT_FACTOR], jnp.float32)
    return jnp.broadcast_to(sc, (h * w, 2))                    # (N, 2)


# ---- Pallas kernel: whole detector head + post-processing, single invocation --
def _detector_kernel(patch_ref, w1_ref, b1_ref, w2_ref, b2_ref, w3_ref, b3_ref,
                     w4_ref, b4_ref, def_ref, scale_ref, out_ref, *, batch, n_pos):
    # Everything is channels-on-sublanes, (batch*positions)-on-lanes.
    x = patch_ref[...]                                         # (9*Cin, B*N)

    # Conv2d(fmap_ch+2, fmap_ch, 3, 1, 1) as im2col matmul + LeakyReLU(0.2),
    # then three 1x1 convs; all computed transposed so activations are
    # (C, B*N) -> full 128-lane tiles.
    h = _leaky(jnp.dot(w1_ref[...], x,
                       preferred_element_type=jnp.float32) + b1_ref[...])
    h = _leaky(jnp.dot(w2_ref[...], h,
                       preferred_element_type=jnp.float32) + b2_ref[...])
    h = _leaky(jnp.dot(w3_ref[...], h,
                       preferred_element_type=jnp.float32) + b3_ref[...])
    out = jnp.dot(w4_ref[...], h,
                  preferred_element_type=jnp.float32) + b4_ref[...]   # (OUT_CH, B*N)

    # torch.split(out, [4, 4, n_classes, 1], dim=channel)  (channels are rows)
    o1 = out[0:4, :]
    o2 = out[4:8, :]
    o3 = out[8:8 + N_CLASSES, :]
    o4 = out[8 + N_CLASSES:8 + N_CLASSES + 1, :]               # (1, B*N)

    # net_util.__limit_xy__(o1, xy_limit_scale) + def_coord
    c_xy = jnp.tanh(o1[0:2, :]) * scale_ref[...] + def_ref[0:2, :]
    c_wh = o1[2:4, :] + def_ref[2:4, :]

    # mu = __cvt_xywh2ltrb__(_o1): write ltrb straight into the output slab
    out_ref[0:2, :] = c_xy - 0.5 * c_wh
    out_ref[2:4, :] = c_xy + 0.5 * c_wh

    # sig = softplus(o2) + clamp_min(cat([wh, wh]), eps) * std_factor
    wh_s = jnp.maximum(c_wh, EPSILON) * STD_FACTOR
    sp = _softplus(o2)
    out_ref[4:6, :] = sp[0:2, :] + wh_s
    out_ref[6:8, :] = sp[2:4, :] + wh_s

    # prob = softmax over classes (class rows -> small sublane reduce)
    m = jnp.max(o3, axis=0, keepdims=True)
    e = jnp.exp(o3 - m)
    out_ref[8:8 + N_CLASSES, :] = e * pl.reciprocal(
        jnp.sum(e, axis=0, keepdims=True), approx=True)

    # pi = softmax over positions per batch: lane-major segment softmax.
    lane = lax.broadcasted_iota(jnp.int32, o4.shape, 1)
    pi = jnp.zeros_like(o4)
    for b in range(batch):                                     # static, tiny B
        seg = (lane >= b * n_pos) & (lane < (b + 1) * n_pos)
        mx = jnp.max(jnp.where(seg, o4, -1e30), axis=1, keepdims=True)
        eb = jnp.where(seg, jnp.exp(o4 - mx), 0.0)
        sb = jnp.sum(eb, axis=1, keepdims=True)
        pi = pi + eb * pl.reciprocal(sb, approx=True)
    out_ref[8 + N_CLASSES:8 + N_CLASSES + 1, :] = pi


def detector_head_pallas(fmap_xy, det_params, def_coord, limit_scale):
    # fmap_xy: (B, H, W, Cin = fmap_ch + 2)
    B, H, W, Cin = fmap_xy.shape
    N = H * W
    BN = B * N

    # im2col (layout glue; all matmuls & math run in the kernel), then fold
    # batch into the lane dimension: (9*Cin, B*N).
    xpad = jnp.pad(fmap_xy, ((0, 0), (1, 1), (1, 1), (0, 0)))
    taps = [xpad[:, dy:dy + H, dx:dx + W, :] for dy in range(3) for dx in range(3)]
    patches_t = jnp.concatenate(taps, axis=-1).reshape(BN, 9 * Cin).T   # (9*Cin, B*N)

    w1, b1, w2, b2, w3, b3, w4, b4 = det_params
    w1t = w1.reshape(9 * Cin, FMAP_CH).T        # (Cout, kh*kw*Cin), matches tap order
    w2t, w3t, w4t = w2.T, w3.T, w4.T
    col = lambda bb: bb.reshape(-1, 1)          # biases as (C, 1) columns

    # constants in the same (C, B*N) layout; columns are batch-major (b*N + n)
    def_t = jnp.tile(def_coord.T, (1, B))       # (4, B*N)
    scale_t = jnp.tile(limit_scale.T, (1, B))   # (2, B*N)

    kernel = partial(_detector_kernel, batch=B, n_pos=N)
    slab = pl.pallas_call(
        kernel,
        out_shape=jax.ShapeDtypeStruct((OUT_CH, BN), jnp.float32),
    )(patches_t, w1t, col(b1), w2t, col(b2), w3t, col(b3), w4t, col(b4),
      def_t, scale_t)

    # back to PyTorch (B, channels, N) convention (one tiny transpose)
    out = jnp.transpose(slab.reshape(OUT_CH, B, N), (1, 0, 2))
    mu = out[:, 0:4]
    sig = out[:, 4:8]
    prob = out[:, 8:8 + N_CLASSES]
    pi = out[:, 8 + N_CLASSES:8 + N_CLASSES + 1]
    return mu, sig, prob, pi


# ---- synthetic backbone (fmap2img_ratio = 0.5) --------------------------------
def backbone_forward(image, bb_w, bb_b):
    # Conv2d(3, fmap_ch, 3, stride=2, pad=1) + LeakyReLU(0.2)
    y = lax.conv_general_dilated(
        image, bb_w, window_strides=(2, 2), padding=((1, 1), (1, 1)),
        dimension_numbers=('NHWC', 'HWIO', 'NHWC'),
        precision=lax.Precision.HIGHEST)
    return _leaky(y + bb_b)


def init_params(key):
    def xavier(k, shape, fan_in, fan_out):
        lim = math.sqrt(6.0 / (fan_in + fan_out))
        return jax.random.uniform(k, shape, jnp.float32, -lim, lim)

    cin = FMAP_CH + 2
    ks = jax.random.split(key, 5)
    return dict(
        bb_w=xavier(ks[0], (3, 3, 3, FMAP_CH), 3 * 9, FMAP_CH * 9),
        bb_b=jnp.zeros((1, FMAP_CH), jnp.float32),
        w1=xavier(ks[1], (3, 3, cin, FMAP_CH), cin * 9, FMAP_CH * 9),
        b1=jnp.zeros((1, FMAP_CH), jnp.float32),
        w2=xavier(ks[2], (FMAP_CH, FMAP_CH), FMAP_CH, FMAP_CH),
        b2=jnp.zeros((1, FMAP_CH), jnp.float32),
        w3=xavier(ks[3], (FMAP_CH, FMAP_CH), FMAP_CH, FMAP_CH),
        b3=jnp.zeros((1, FMAP_CH), jnp.float32),
        w4=xavier(ks[4], (FMAP_CH, OUT_CH), FMAP_CH, OUT_CH),
        b4=jnp.zeros((1, OUT_CH), jnp.float32),
    )


# ---- full forward (Pallas path) ------------------------------------------------
def mmod_forward(image, params):
    B = image.shape[0]
    fmap = backbone_forward(image, params['bb_w'], params['bb_b'])
    h, w = fmap.shape[1], fmap.shape[2]
    xy_map = jnp.broadcast_to(create_xy_map(h, w)[None], (B, h, w, 2))
    fmap_xy = jnp.concatenate([fmap, xy_map], axis=-1)       # torch.cat(dim=1) in NCHW
    def_coord = create_def_coord(h, w)
    limit_scale = create_limit_scale(h, w)
    det_params = (params['w1'], params['b1'], params['w2'], params['b2'],
                  params['w3'], params['b3'], params['w4'], params['b4'])
    return detector_head_pallas(fmap_xy, det_params, def_coord, limit_scale)


# ---- pure-JAX reference for correctness ----------------------------------------
def mmod_forward_ref(image, params):
    B = image.shape[0]
    fmap = backbone_forward(image, params['bb_w'], params['bb_b'])
    h, w = fmap.shape[1], fmap.shape[2]
    xy_map = jnp.broadcast_to(create_xy_map(h, w)[None], (B, h, w, 2))
    x = jnp.concatenate([fmap, xy_map], axis=-1)
    hi = lax.Precision.HIGHEST
    y = lax.conv_general_dilated(x, params['w1'], (1, 1), ((1, 1), (1, 1)),
                                 dimension_numbers=('NHWC', 'HWIO', 'NHWC'),
                                 precision=hi) + params['b1']
    y = _leaky(y)
    y = _leaky(jnp.einsum('bhwc,cd->bhwd', y, params['w2'], precision=hi) + params['b2'])
    y = _leaky(jnp.einsum('bhwc,cd->bhwd', y, params['w3'], precision=hi) + params['b3'])
    y = jnp.einsum('bhwc,cd->bhwd', y, params['w4'], precision=hi) + params['b4']
    out = jnp.transpose(y.reshape(B, h * w, OUT_CH), (0, 2, 1))  # (B, OUT_CH, N)

    o1, o2 = out[:, 0:4], out[:, 4:8]
    o3, o4 = out[:, 8:8 + N_CLASSES], out[:, 8 + N_CLASSES:]
    dc = create_def_coord(h, w).T[None]
    sc = create_limit_scale(h, w).T[None]
    xy = jnp.tanh(o1[:, :2]) * sc
    _o1 = jnp.concatenate([xy, o1[:, 2:]], axis=1) + dc
    _wh = _o1[:, 2:]
    _whwh = jnp.maximum(jnp.concatenate([_wh, _wh], axis=1), EPSILON)
    mu = jnp.concatenate([_o1[:, :2] - 0.5 * _o1[:, 2:],
                          _o1[:, :2] + 0.5 * _o1[:, 2:]], axis=1)
    sig = _softplus(o2) + _whwh * STD_FACTOR
    prob = _softmax(o3, axis=1)
    pi = _softmax(o4, axis=2)
    return mu, sig, prob, pi


if __name__ == "__main__":
    key = jax.random.PRNGKey(0)
    pkey, xkey = jax.random.split(key)
    params = init_params(pkey)
    image = jax.random.normal(xkey, (BATCH_SIZE, IMG_H, IMG_W, 3), jnp.float32)

    outs = jax.block_until_ready(jax.jit(mmod_forward)(image, params))
    refs = jax.block_until_ready(jax.jit(mmod_forward_ref)(image, params))

    names = ("mu", "sig", "prob", "pi")
    for name, o, r in zip(names, outs, refs):
        assert o.shape == r.shape, (name, o.shape, r.shape)
        np.testing.assert_allclose(np.asarray(o), np.asarray(r),
                                   rtol=2e-3, atol=2e-3, err_msg=name)
    print("KERNEL_OK")
</pallas_src>

<mosaic_0001>
module attributes {stable_mosaic.version = 11 : i64} {
  func.func @_detector_kernel(%arg0: memref<306x128xf32, #tpu.memory_space<vmem>>, %arg1: memref<32x306xf32, #tpu.memory_space<vmem>>, %arg2: memref<32x1xf32, #tpu.memory_space<vmem>>, %arg3: memref<32x32xf32, #tpu.memory_space<vmem>>, %arg4: memref<32x1xf32, #tpu.memory_space<vmem>>, %arg5: memref<32x32xf32, #tpu.memory_space<vmem>>, %arg6: memref<32x1xf32, #tpu.memory_space<vmem>>, %arg7: memref<13x32xf32, #tpu.memory_space<vmem>>, %arg8: memref<13x1xf32, #tpu.memory_space<vmem>>, %arg9: memref<4x128xf32, #tpu.memory_space<vmem>>, %arg10: memref<2x128xf32, #tpu.memory_space<vmem>>, %arg11: memref<13x128xf32, #tpu.memory_space<vmem>>) attributes {dimension_semantics = [], scalar_prefetch = 0 : i64, scratch_operands = 0 : i64, tpu.core_type = #tpu.core_type<tc>} {
    %c0 = arith.constant 0 : index
    %c0_0 = arith.constant 0 : index
    %0 = vector.load %arg0[%c0, %c0_0] : memref<306x128xf32, #tpu.memory_space<vmem>>, vector<306x128xf32>
    %c0_1 = arith.constant 0 : index
    %c0_2 = arith.constant 0 : index
    %1 = vector.load %arg1[%c0_1, %c0_2] : memref<32x306xf32, #tpu.memory_space<vmem>>, vector<32x306xf32>
    %cst = arith.constant dense<0.000000e+00> : vector<32x128xf32>
    %2 = tpu.matmul %1, %0, %cst {dimension_numbers = #tpu.dot_dimension_numbers<[1], [0], [0], [1], [0, 0, 1, 1], [], []>} : vector<32x306xf32>, vector<306x128xf32>, vector<32x128xf32> -> vector<32x128xf32>
    %c0_3 = arith.constant 0 : index
    %c0_4 = arith.constant 0 : index
    %3 = vector.load %arg2[%c0_3, %c0_4] : memref<32x1xf32, #tpu.memory_space<vmem>>, vector<32x1xf32>
    %4 = vector.broadcast %3 : vector<32x1xf32> to vector<32x128xf32>
    %5 = arith.addf %2, %4 : vector<32x128xf32>
    %cst_5 = arith.constant 0.000000e+00 : f32
    %6 = vector.broadcast %cst_5 : f32 to vector<32x128xf32>
    %7 = arith.cmpf ogt, %5, %6 : vector<32x128xf32>
    %cst_6 = arith.constant 2.000000e-01 : f32
    %8 = vector.broadcast %cst_6 : f32 to vector<32x128xf32>
    %9 = arith.mulf %8, %5 : vector<32x128xf32>
    %10 = arith.select %7, %5, %9 : vector<32x128xi1>, vector<32x128xf32>
    %c0_7 = arith.constant 0 : index
    %c0_8 = arith.constant 0 : index
    %11 = vector.load %arg3[%c0_7, %c0_8] : memref<32x32xf32, #tpu.memory_space<vmem>>, vector<32x32xf32>
    %cst_9 = arith.constant dense<0.000000e+00> : vector<32x128xf32>
    %12 = tpu.matmul %11, %10, %cst_9 {dimension_numbers = #tpu.dot_dimension_numbers<[1], [0], [0], [1], [0, 0, 1, 1], [], []>} : vector<32x32xf32>, vector<32x128xf32>, vector<32x128xf32> -> vector<32x128xf32>
    %c0_10 = arith.constant 0 : index
    %c0_11 = arith.constant 0 : index
    %13 = vector.load %arg4[%c0_10, %c0_11] : memref<32x1xf32, #tpu.memory_space<vmem>>, vector<32x1xf32>
    %14 = vector.broadcast %13 : vector<32x1xf32> to vector<32x128xf32>
    %15 = arith.addf %12, %14 : vector<32x128xf32>
    %cst_12 = arith.constant 0.000000e+00 : f32
    %16 = vector.broadcast %cst_12 : f32 to vector<32x128xf32>
    %17 = arith.cmpf ogt, %15, %16 : vector<32x128xf32>
    %cst_13 = arith.constant 2.000000e-01 : f32
    %18 = vector.broadcast %cst_13 : f32 to vector<32x128xf32>
    %19 = arith.mulf %18, %15 : vector<32x128xf32>
    %20 = arith.select %17, %15, %19 : vector<32x128xi1>, vector<32x128xf32>
    %c0_14 = arith.constant 0 : index
    %c0_15 = arith.constant 0 : index
    %21 = vector.load %arg5[%c0_14, %c0_15] : memref<32x32xf32, #tpu.memory_space<vmem>>, vector<32x32xf32>
    %cst_16 = arith.constant dense<0.000000e+00> : vector<32x128xf32>
    %22 = tpu.matmul %21, %20, %cst_16 {dimension_numbers = #tpu.dot_dimension_numbers<[1], [0], [0], [1], [0, 0, 1, 1], [], []>} : vector<32x32xf32>, vector<32x128xf32>, vector<32x128xf32> -> vector<32x128xf32>
    %c0_17 = arith.constant 0 : index
    %c0_18 = arith.constant 0 : index
    %23 = vector.load %arg6[%c0_17, %c0_18] : memref<32x1xf32, #tpu.memory_space<vmem>>, vector<32x1xf32>
    %24 = vector.broadcast %23 : vector<32x1xf32> to vector<32x128xf32>
    %25 = arith.addf %22, %24 : vector<32x128xf32>
    %cst_19 = arith.constant 0.000000e+00 : f32
    %26 = vector.broadcast %cst_19 : f32 to vector<32x128xf32>
    %27 = arith.cmpf ogt, %25, %26 : vector<32x128xf32>
    %cst_20 = arith.constant 2.000000e-01 : f32
    %28 = vector.broadcast %cst_20 : f32 to vector<32x128xf32>
    %29 = arith.mulf %28, %25 : vector<32x128xf32>
    %30 = arith.select %27, %25, %29 : vector<32x128xi1>, vector<32x128xf32>
    %c0_21 = arith.constant 0 : index
    %c0_22 = arith.constant 0 : index
    %31 = vector.load %arg7[%c0_21, %c0_22] : memref<13x32xf32, #tpu.memory_space<vmem>>, vector<13x32xf32>
    %cst_23 = arith.constant dense<0.000000e+00> : vector<13x128xf32>
    %32 = tpu.matmul %31, %30, %cst_23 {dimension_numbers = #tpu.dot_dimension_numbers<[1], [0], [0], [1], [0, 0, 1, 1], [], []>} : vector<13x32xf32>, vector<32x128xf32>, vector<13x128xf32> -> vector<13x128xf32>
    %c0_24 = arith.constant 0 : index
    %c0_25 = arith.constant 0 : index
    %33 = vector.load %arg8[%c0_24, %c0_25] : memref<13x1xf32, #tpu.memory_space<vmem>>, vector<13x1xf32>
    %34 = vector.broadcast %33 : vector<13x1xf32> to vector<13x128xf32>
    %35 = arith.addf %32, %34 : vector<13x128xf32>
    %36 = vector.extract_strided_slice %35 {offsets = [0, 0], sizes = [4, 128], strides = [1, 1]} : vector<13x128xf32> to vector<4x128xf32>
    %37 = vector.extract_strided_slice %35 {offsets = [4, 0], sizes = [4, 128], strides = [1, 1]} : vector<13x128xf32> to vector<4x128xf32>
    %38 = vector.extract_strided_slice %35 {offsets = [8, 0], sizes = [4, 128], strides = [1, 1]} : vector<13x128xf32> to vector<4x128xf32>
    %39 = vector.extract_strided_slice %35 {offsets = [12, 0], sizes = [1, 128], strides = [1, 1]} : vector<13x128xf32> to vector<1x128xf32>
    %40 = vector.extract_strided_slice %36 {offsets = [0, 0], sizes = [2, 128], strides = [1, 1]} : vector<4x128xf32> to vector<2x128xf32>
    %41 = math.tanh %40 : vector<2x128xf32>
    %c0_26 = arith.constant 0 : index
    %c0_27 = arith.constant 0 : index
    %42 = vector.load %arg10[%c0_26, %c0_27] : memref<2x128xf32, #tpu.memory_space<vmem>>, vector<2x128xf32>
    %43 = arith.mulf %41, %42 : vector<2x128xf32>
    %c0_28 = arith.constant 0 : index
    %c0_29 = arith.constant 0 : index
    %44 = vector.load %arg9[%c0_28, %c0_29] : memref<4x128xf32, #tpu.memory_space<vmem>>, vector<2x128xf32>
    %45 = arith.addf %43, %44 : vector<2x128xf32>
    %46 = vector.extract_strided_slice %36 {offsets = [2, 0], sizes = [2, 128], strides = [1, 1]} : vector<4x128xf32> to vector<2x128xf32>
    %c2 = arith.constant 2 : index
    %c0_30 = arith.constant 0 : index
    %47 = vector.load %arg9[%c2, %c0_30] : memref<4x128xf32, #tpu.memory_space<vmem>>, vector<2x128xf32>
    %48 = arith.addf %46, %47 : vector<2x128xf32>
    %cst_31 = arith.constant 5.000000e-01 : f32
    %49 = vector.broadcast %cst_31 : f32 to vector<2x128xf32>
    %50 = arith.mulf %49, %48 : vector<2x128xf32>
    %51 = arith.subf %45, %50 : vector<2x128xf32>
    %c0_32 = arith.constant 0 : index
    %c0_33 = arith.constant 0 : index
    %52 = vector.load %arg11[%c0_32, %c0_33] : memref<13x128xf32, #tpu.memory_space<vmem>>, vector<2x128xf32>
    tpu.vector_store %arg11[%c0_32, %c0_33], %51 {strides = array<i32>} : memref<13x128xf32, #tpu.memory_space<vmem>>, vector<2x128xf32>,
    %cst_34 = arith.constant 5.000000e-01 : f32
    %53 = vector.broadcast %cst_34 : f32 to vector<2x128xf32>
    %54 = arith.mulf %53, %48 : vector<2x128xf32>
    %55 = arith.addf %45, %54 : vector<2x128xf32>
    %c2_35 = arith.constant 2 : index
    %c0_36 = arith.constant 0 : index
    %56 = vector.load %arg11[%c2_35, %c0_36] : memref<13x128xf32, #tpu.memory_space<vmem>>, vector<2x128xf32>
    tpu.vector_store %arg11[%c2_35, %c0_36], %55 {strides = array<i32>} : memref<13x128xf32, #tpu.memory_space<vmem>>, vector<2x128xf32>,
    %cst_37 = arith.constant 9.99999996E-13 : f32
    %57 = vector.broadcast %cst_37 : f32 to vector<2x128xf32>
    %58 = arith.maximumf %48, %57 : vector<2x128xf32>
    %cst_38 = arith.constant 1.000000e-01 : f32
    %59 = vector.broadcast %cst_38 : f32 to vector<2x128xf32>
    %60 = arith.mulf %58, %59 : vector<2x128xf32>
    %cst_39 = arith.constant 0.000000e+00 : f32
    %61 = vector.broadcast %cst_39 : f32 to vector<4x128xf32>
    %62 = arith.maximumf %37, %61 : vector<4x128xf32>
    %63 = math.absf %37 : vector<4x128xf32>
    %cst_40 = arith.constant 0.000000e+00 : f32
    %64 = vector.broadcast %cst_40 : f32 to vector<4x128xf32>
    %65 = arith.subf %64, %63 : vector<4x128xf32>
    %66 = math.exp %65 : vector<4x128xf32>
    %67 = math.log1p %66 : vector<4x128xf32>
    %68 = arith.addf %62, %67 : vector<4x128xf32>
    %69 = vector.extract_strided_slice %68 {offsets = [0, 0], sizes = [2, 128], strides = [1, 1]} : vector<4x128xf32> to vector<2x128xf32>
    %70 = arith.addf %69, %60 : vector<2x128xf32>
    %c4 = arith.constant 4 : index
    %c0_41 = arith.constant 0 : index
    %71 = vector.load %arg11[%c4, %c0_41] : memref<13x128xf32, #tpu.memory_space<vmem>>, vector<2x128xf32>
    tpu.vector_store %arg11[%c4, %c0_41], %70 {strides = array<i32>} : memref<13x128xf32, #tpu.memory_space<vmem>>, vector<2x128xf32>,
    %72 = vector.extract_strided_slice %68 {offsets = [2, 0], sizes = [2, 128], strides = [1, 1]} : vector<4x128xf32> to vector<2x128xf32>
    %73 = arith.addf %72, %60 : vector<2x128xf32>
    %c6 = arith.constant 6 : index
    %c0_42 = arith.constant 0 : index
    %74 = vector.load %arg11[%c6, %c0_42] : memref<13x128xf32, #tpu.memory_space<vmem>>, vector<2x128xf32>
    tpu.vector_store %arg11[%c6, %c0_42], %73 {strides = array<i32>} : memref<13x128xf32, #tpu.memory_space<vmem>>, vector<2x128xf32>,
    %cst_43 = arith.constant dense<0xFF800000> : vector<128xf32>
    %75 = vector.multi_reduction <maximumf>, %38, %cst_43 [0] : vector<4x128xf32> to vector<128xf32>
    %76 = vector.shape_cast %75 : vector<128xf32> to vector<1x128xf32>
    %77 = vector.broadcast %76 : vector<1x128xf32> to vector<4x128xf32>
    %78 = arith.subf %38, %77 : vector<4x128xf32>
    %79 = math.exp %78 : vector<4x128xf32>
    %cst_44 = arith.constant dense<0.000000e+00> : vector<128xf32>
    %80 = vector.multi_reduction <add>, %79, %cst_44 [0] : vector<4x128xf32> to vector<128xf32>
    %81 = vector.shape_cast %80 : vector<128xf32> to vector<1x128xf32>
    %82 = tpu.reciprocal %81 {approx = true} : vector<1x128xf32> -> vector<1x128xf32>
    %83 = vector.broadcast %82 : vector<1x128xf32> to vector<4x128xf32>
    %84 = arith.mulf %79, %83 : vector<4x128xf32>
    %c8 = arith.constant 8 : index
    %c0_45 = arith.constant 0 : index
    %85 = vector.load %arg11[%c8, %c0_45] : memref<13x128xf32, #tpu.memory_space<vmem>>, vector<4x128xf32>
    tpu.vector_store %arg11[%c8, %c0_45], %84 {strides = array<i32>} : memref<13x128xf32, #tpu.memory_space<vmem>>, vector<4x128xf32>,
    %86 = tpu.iota {dimensions = array<i32: 1>} : vector<1x128xi32>
    %cst_46 = arith.constant 0.000000e+00 : f32
    %87 = vector.broadcast %cst_46 : f32 to vector<1x128xf32>
    %c0_i32 = arith.constant 0 : i32
    %88 = vector.broadcast %c0_i32 : i32 to vector<1x128xi32>
    %89 = arith.cmpi sge, %86, %88 : vector<1x128xi32>
    %c64_i32 = arith.constant 64 : i32
    %90 = vector.broadcast %c64_i32 : i32 to vector<1x128xi32>
    %91 = arith.cmpi slt, %86, %90 : vector<1x128xi32>
    %92 = arith.andi %89, %91 : vector<1x128xi1>
    %cst_47 = arith.constant -1.000000e+30 : f32
    %93 = vector.broadcast %cst_47 : f32 to vector<1x128xf32>
    %94 = arith.select %92, %39, %93 : vector<1x128xi1>, vector<1x128xf32>
    %cst_48 = arith.constant dense<0xFF800000> : vector<1xf32>
    %95 = vector.multi_reduction <maximumf>, %94, %cst_48 [1] : vector<1x128xf32> to vector<1xf32>
    %96 = vector.shape_cast %95 : vector<1xf32> to vector<1x1xf32>
    %97 = vector.broadcast %96 : vector<1x1xf32> to vector<1x128xf32>
    %98 = arith.subf %39, %97 : vector<1x128xf32>
    %99 = math.exp %98 : vector<1x128xf32>
    %cst_49 = arith.constant 0.000000e+00 : f32
    %100 = vector.broadcast %cst_49 : f32 to vector<1x128xf32>
    %101 = arith.select %92, %99, %100 : vector<1x128xi1>, vector<1x128xf32>
    %cst_50 = arith.constant dense<0.000000e+00> : vector<1xf32>
    %102 = vector.multi_reduction <add>, %101, %cst_50 [1] : vector<1x128xf32> to vector<1xf32>
    %103 = vector.shape_cast %102 : vector<1xf32> to vector<1x1xf32>
    %104 = tpu.reciprocal %103 {approx = true} : vector<1x1xf32> -> vector<1x1xf32>
    %105 = vector.broadcast %104 : vector<1x1xf32> to vector<1x128xf32>
    %106 = arith.mulf %101, %105 : vector<1x128xf32>
    %107 = arith.addf %87, %106 : vector<1x128xf32>
    %c64_i32_51 = arith.constant 64 : i32
    %108 = vector.broadcast %c64_i32_51 : i32 to vector<1x128xi32>
    %109 = arith.cmpi sge, %86, %108 : vector<1x128xi32>
    %c128_i32 = arith.constant 128 : i32
    %110 = vector.broadcast %c128_i32 : i32 to vector<1x128xi32>
    %111 = arith.cmpi slt, %86, %110 : vector<1x128xi32>
    %112 = arith.andi %109, %111 : vector<1x128xi1>
    %cst_52 = arith.constant -1.000000e+30 : f32
    %113 = vector.broadcast %cst_52 : f32 to vector<1x128xf32>
    %114 = arith.select %112, %39, %113 : vector<1x128xi1>, vector<1x128xf32>
    %cst_53 = arith.constant dense<0xFF800000> : vector<1xf32>
    %115 = vector.multi_reduction <maximumf>, %114, %cst_53 [1] : vector<1x128xf32> to vector<1xf32>
    %116 = vector.shape_cast %115 : vector<1xf32> to vector<1x1xf32>
    %117 = vector.broadcast %116 : vector<1x1xf32> to vector<1x128xf32>
    %118 = arith.subf %39, %117 : vector<1x128xf32>
    %119 = math.exp %118 : vector<1x128xf32>
    %cst_54 = arith.constant 0.000000e+00 : f32
    %120 = vector.broadcast %cst_54 : f32 to vector<1x128xf32>
    %121 = arith.select %112, %119, %120 : vector<1x128xi1>, vector<1x128xf32>
    %cst_55 = arith.constant dense<0.000000e+00> : vector<1xf32>
    %122 = vector.multi_reduction <add>, %121, %cst_55 [1] : vector<1x128xf32> to vector<1xf32>
    %123 = vector.shape_cast %122 : vector<1xf32> to vector<1x1xf32>
    %124 = tpu.reciprocal %123 {approx = true} : vector<1x1xf32> -> vector<1x1xf32>
    %125 = vector.broadcast %124 : vector<1x1xf32> to vector<1x128xf32>
    %126 = arith.mulf %121, %125 : vector<1x128xf32>
    %127 = arith.addf %107, %126 : vector<1x128xf32>
    %c12 = arith.constant 12 : index
    %c0_56 = arith.constant 0 : index
    %128 = vector.load %arg11[%c12, %c0_56] : memref<13x128xf32, #tpu.memory_space<vmem>>, vector<1x128xf32>
    tpu.vector_store %arg11[%c12, %c0_56], %127 {strides = array<i32>} : memref<13x128xf32, #tpu.memory_space<vmem>>, vector<1x128xf32>,
    return
  }
}

</mosaic_0001>

<bundles_post_ra>
// kernel: tile.11
= control target key start
LH: loop header
LB: loop body
LE: loop exit
PB: predicated region body
PF: predicated region fallthrough
CT: control target
= control target key end

     0   :  { %vm19_vm0 = vcmask 523264   ;;  %vm25_vm1 = vcmask 1048064   ;;  %s63_s0 = inlined_call_operand.vmem [shape: f32[4,2,64], index: 0, kind: input, shape index: {}]   ;;  %s64_s1 = inlined_call_operand.vmem [shape: f32[4,128], index: 1, kind: output, shape index: {}]  }
   0x1   :  { %v33_v0 = vld [vmem:[%s63_s0 + $0x6] sm:$0x3]  ;;  %v34_v1 = vld [vmem:[%s63_s0 + $0x4] sm:$0x3]  ;;  %v35_v2 = vld [vmem:[%s63_s0 + $0x2] sm:$0x3] }
   0x2   :  { %7 = vst [vmem:[#allocation1 + $0x18] sm:$0x3] %v33_v0  ;;  %v16_v3 = vld [vmem:[%s63_s0] sm:$0x3]  ;;  %s37_s0 = smov 64  }
   0x3   :  { %11 = vst [vmem:[#allocation1 + $0x10] sm:$0x3] %v34_v1 }
   0x4   :  { %15 = vst [vmem:[#allocation1 + $0x8] sm:$0x3] %v35_v2 }
   0x5   :  { %17 = vst [vmem:[#allocation1] sm:$0x3] %v16_v3 }
   0xc   :  { %v22_v4 = vld [vmem:[#allocation1 + $0x1] ss:$8 sm:$0xf]   ;;  %v18_v5 = vld [vmem:[#allocation1] ss:$8 sm:$0xf]  }
   0xd   :  { %23 = vrot.lane.b32.xlu0 %v22_v4, %s37_s0  ;;  %20 = vst.msk [vmem:[#allocation0] sm:$0xf] %vm19_vm0, %v18_v5  }
  0x7f   :  { %v24_v6 = vpop.permute.xlu0 %23  }
  0x80   :  { %26 = vst.msk [vmem:[#allocation0] sm:$0xf] %vm25_vm1, %v24_v6  }
  0x87   :  { %v29_v7 = vld [vmem:[#allocation0] sm:$0xf] }
  0x88   :  { %32 = vst [vmem:[%s64_s1] sm:$0xf] %v29_v7 }

// kernel: tile.6
= control target key start
LH: loop header
LB: loop body
LE: loop exit
PB: predicated region body
PF: predicated region fallthrough
CT: control target
= control target key end

     0   :  { %s20_s0 = inlined_call_operand.<no memory space> [shape: f32[], index: 0, kind: input, shape index: {}]   ;;  %s21_s1 = inlined_call_operand.vmem [shape: f32[2,128], index: 1, kind: output, shape index: {}]  }
   0x1   :  { %v2_v0 = vstv %s20_s0 }
   0x2   :  { %3 = vst [vmem:[%s21_s1] sm:$0x3] %v2_v0 }

// kernel: mmod_forward.1
= control target key start
LH: loop header
LB: loop body
LE: loop exit
PB: predicated region body
PF: predicated region fallthrough
CT: control target
= control target key end

     0   :  { %v579_v3 = vmov 0   ;;  %vm126_vm0 = vcmask 1041408   ;;  %vm113_vm1 = vcmask 408576   ;;  %vm257_vm6 = vcmask 261120   ;;  %s932_s0 = inlined_call_operand.vmem [shape: f32[306,128], index: 0, kind: input, shape index: {}]   ;;  %s933_s2 = inlined_call_operand.vmem [shape: f32[32,1], index: 2, kind: input, shape index: {}]   ;;  %s934_s1 = inlined_call_operand.vmem [shape: f32[32,306], index: 1, kind: input, shape index: {}]   ;;  %s935_s4 = inlined_call_operand.vmem [shape: f32[32,1], index: 4, kind: input, shape index: {}]   ;;  %s936_s6 = inlined_call_operand.vmem [shape: f32[32,1], index: 6, kind: input, shape index: {}]   ;;  %s937_s8 = inlined_call_operand.vmem [shape: f32[13,1], index: 8, kind: input, shape index: {}]   ;;  %s938_s3 = inlined_call_operand.vmem [shape: f32[32,32], index: 3, kind: input, shape index: {}]   ;;  %s939_s5 = inlined_call_operand.vmem [shape: f32[32,32], index: 5, kind: input, shape index: {}]   ;;  %s940_s7 = inlined_call_operand.vmem [shape: f32[13,32], index: 7, kind: input, shape index: {}]   ;;  %s941_s9 = inlined_call_operand.vmem [shape: f32[4,128], index: 9, kind: input, shape index: {}]   ;;  %s942_s10 = inlined_call_operand.vmem [shape: f32[2,128], index: 10, kind: input, shape index: {}]   ;;  %s943_s11 = inlined_call_operand.vmem [shape: f32[13,128], index: 11, kind: output, shape index: {}]  }
   0x1   :  { %v53_v0 = vld [vmem:[%s932_s0 + $0x78] sm:$0xff]  ;;  %v52_v1 = vld [vmem:[%s932_s0 + $0x70] sm:$0xff]  ;;  %558 = vset.pattern.permute.xlu0 %v579_v3  ;;  %559 = vset.pattern.permute.xlu1 %v579_v3  ;;  %v51_v5 = vld [vmem:[%s932_s0 + $0x68] sm:$0xff]  ;;  %vm479_vm15 = vcmask 1043456  }
   0x2   :  { %v69_v2 = vld [vmem:[%s932_s0 + $0xf8] sm:$0xff]  ;;  %130 = vmatpush.msra.mxu0 %v53_v0  ;;  %v68_v4 = vld [vmem:[%s932_s0 + $0xf0] sm:$0xff]  ;;  %v67_v6 = vld [vmem:[%s932_s0 + $0xe8] sm:$0xff]  ;;  %560 = vset.pattern.permute.xlu2 %v579_v3 }
   0x3   :  { %159 = vmatpush.msra.mxu1 %v69_v2  ;;  %v50_v7 = vld [vmem:[%s932_s0 + $0x60] sm:$0xff]  ;;  %v76_v9 = vld [vmem:[%s932_s0 + $0x130] sm:$0x3]  ;;  %v49_v10 = vld [vmem:[%s932_s0 + $0x58] sm:$0xff] }
   0x4   :  { %131 = vmatpush.msra.mxu0 %v52_v1  ;;  %v66_v8 = vld [vmem:[%s932_s0 + $0xe0] sm:$0xff]  ;;  %v65_v11 = vld [vmem:[%s932_s0 + $0xd8] sm:$0xff]  ;;  %542 = vmatpush.msk.msra.mxu2 %vm126_vm0, %v76_v9  ;;  %v75_v12 = vld [vmem:[%s932_s0 + $0x128] sm:$0xff] }
   0x5   :  { %160 = vmatpush.msra.mxu1 %v68_v4  ;;  %v92_v13 = vld [vmem:[%s933_s2 + $0x18] sm:$0xff]  ;;  %v48_v14 = vld [vmem:[%s932_s0 + $0x50] sm:$0xff]  ;;  %v74_v16 = vld [vmem:[%s932_s0 + $0x120] sm:$0xff] }
   0x6   :  { %132 = vmatpush.msra.mxu0 %v51_v5  ;;  %v64_v15 = vld [vmem:[%s932_s0 + $0xd0] sm:$0xff]  ;;  %198 = vmatpush.msra.mxu2 %v75_v12  ;;  %v73_v17 = vld [vmem:[%s932_s0 + $0x118] sm:$0xff]  ;;  %v47_v18 = vld [vmem:[%s932_s0 + $0x48] sm:$0xff] }
   0x7   :  { %161 = vmatpush.msra.mxu1 %v67_v6  ;;  %110 = vperm.xlu0 %558, %v92_v13   ;;  %v63_v19 = vld [vmem:[%s932_s0 + $0xc8] sm:$0xff]  ;;  %v72_v20 = vld [vmem:[%s932_s0 + $0x110] sm:$0xff]  ;;  %v46_v21 = vld [vmem:[%s932_s0 + $0x40] sm:$0xff] }
   0x8   :  { %133 = vmatpush.msra.mxu0 %v50_v7  ;;  %199 = vmatpush.msra.mxu2 %v74_v16  ;;  %v62_v22 = vld [vmem:[%s932_s0 + $0xc0] sm:$0xff]  ;;  %v71_v23 = vld [vmem:[%s932_s0 + $0x108] sm:$0xff]  ;;  %v91_v24 = vld [vmem:[%s933_s2 + $0x10] sm:$0xff] }
   0x9   :  { %162 = vmatpush.msra.mxu1 %v66_v8  ;;  %v45_v25 = vld [vmem:[%s932_s0 + $0x38] sm:$0xff]  ;;  %v70_v27 = vld [vmem:[%s932_s0 + $0x100] sm:$0xff]  ;;  %v90_v28 = vld [vmem:[%s933_s2 + $0x8] sm:$0xff] }
   0xa   :  { %134 = vmatpush.msra.mxu0 %v49_v10  ;;  %200 = vmatpush.msra.mxu2 %v73_v17  ;;  %v61_v26 = vld [vmem:[%s932_s0 + $0xb8] sm:$0xff]  ;;  %v44_v29 = vld [vmem:[%s932_s0 + $0x30] sm:$0xff]  ;;  %v43_v32 = vld [vmem:[%s932_s0 + $0x28] sm:$0xff] }
   0xb   :  { %163 = vmatpush.msra.mxu1 %v65_v11  ;;  %v60_v30 = vld [vmem:[%s932_s0 + $0xb0] sm:$0xff]  ;;  %v59_v33 = vld [vmem:[%s932_s0 + $0xa8] sm:$0xff]  ;;  %100 = vperm.xlu1 %559, %v90_v28   ;;  %v42_v34 = vld [vmem:[%s932_s0 + $0x20] sm:$0xff] }
   0xc   :  { %135 = vmatpush.msra.mxu0 %v48_v14  ;;  %201 = vmatpush.msra.mxu2 %v72_v20  ;;  %v79_v31 = vld [vmem:[%s934_s1 + $0x10] sm:$0xff]  ;;  %v58_v35 = vld [vmem:[%s932_s0 + $0xa0] sm:$0xff]  ;;  %v234_v36 = vld [vmem:[%s935_s4 + $0x8] sm:$0xff] }
   0xd   :  { %164 = vmatpush.msra.mxu1 %v64_v15  ;;  %v41_v37 = vld [vmem:[%s932_s0 + $0x18] sm:$0xff]  ;;  %v89_v39 = vld [vmem:[%s933_s2] sm:$0xff]  ;;  %v40_v40 = vld [vmem:[%s932_s0 + $0x10] sm:$0xff] }
   0xe   :  { %136 = vmatpush.msra.mxu0 %v47_v18  ;;  %202 = vmatpush.msra.mxu2 %v71_v23  ;;  %v57_v38 = vld [vmem:[%s932_s0 + $0x98] sm:$0xff]  ;;  %v56_v41 = vld [vmem:[%s932_s0 + $0x90] sm:$0xff]  ;;  %v82_v42 = vld [vmem:[%s934_s1 + $0x28] sm:$0xff] }
   0xf   :  { %165 = vmatpush.msra.mxu1 %v63_v19  ;;  %105 = vperm.xlu0 %558, %v91_v24   ;;  %v39_v43 = vld [vmem:[%s932_s0 + $0x8] sm:$0xff]  ;;  %v38_v45 = vld [vmem:[%s932_s0] sm:$0xff]  ;;  %v317_v49 = vld [vmem:[%s936_s6 + $0x10] sm:$0xff] }
  0x10   :  { %137 = vmatpush.msra.mxu0 %v46_v21  ;;  %203 = vmatpush.msra.mxu2 %v70_v27  ;;  %v55_v44 = vld [vmem:[%s932_s0 + $0x88] sm:$0xff]  ;;  %v54_v46 = vld [vmem:[%s932_s0 + $0x80] sm:$0xff]  ;;  %v80_v52 = vld [vmem:[%s934_s1 + $0x18] sm:$0xff] }
  0x11   :  { %166 = vmatpush.msra.mxu1 %v62_v22  ;;  %543 = vmatmul.msk.f32.vlgmr.msra.gmra.mxu2 %vm113_vm1, %v79_v31  ;;  %v77_v47 = vld [vmem:[%s934_s1] sm:$0xff]  ;;  %v78_v48 = vld [vmem:[%s934_s1 + $0x8] sm:$0xff]  ;;  %v88_v56 = vld [vmem:[%s934_s1 + $0x58] sm:$0xff] }
  0x12   :  { %138 = vmatpush.msra.mxu0 %v45_v25  ;;  %v233_v50 = vld [vmem:[%s935_s4] sm:$0xff]  ;;  %v395_v54 = vld [vmem:[%s937_s8 + $0x8] sm:$0x1f]  ;;  %v83_v57 = vld [vmem:[%s934_s1 + $0x30] sm:$0xff] }
  0x13   :  { %167 = vmatpush.msra.mxu1 %v61_v26  ;;  %95 = vperm.xlu1 %559, %v89_v39   ;;  %v85_v51 = vld [vmem:[%s934_s1 + $0x40] sm:$0xff]  ;;  %v316_v55 = vld [vmem:[%s936_s6 + $0x8] sm:$0xff]  ;;  %v84_v58 = vld [vmem:[%s934_s1 + $0x38] sm:$0xff] }
  0x14   :  { %139 = vmatpush.msra.mxu0 %v44_v29  ;;  %v81_v53 = vld [vmem:[%s934_s1 + $0x20] sm:$0xff]  ;;  %v86_v60 = vld [vmem:[%s934_s1 + $0x48] sm:$0xff]  ;;  %v87_v61 = vld [vmem:[%s934_s1 + $0x50] sm:$0xff] }
  0x15   :  { %168 = vmatpush.msra.mxu1 %v60_v30  ;;  %v394_v59 = vld [vmem:[%s937_s8] sm:$0xff]  ;;  %v236_v30 = vld [vmem:[%s935_s4 + $0x18] sm:$0xff]  ;;  %v231_v39 = vld [vmem:[%s938_s3 + $0x10] sm:$0xff] }
  0x16   :  { %140 = vmatpush.msra.mxu0 %v43_v32  ;;  %254 = vperm.xlu2 %560, %v236_v30  }
  0x17   :  { %169 = vmatpush.msra.mxu1 %v59_v33  ;;  %244 = vperm.xlu0 %558, %v234_v36   ;;  %v235_v36 = vld [vmem:[%s935_s4 + $0x10] sm:$0xff] }
  0x18   :  { %141 = vmatpush.msra.mxu0 %v42_v34  ;;  %v229_v34 = vld [vmem:[%s938_s3] sm:$0xff] }
  0x19   :  { %170 = vmatpush.msra.mxu1 %v58_v35  ;;  %544 = vmatmul.msk.f32.gmra.mxu2 %vm113_vm1, %v82_v42 }
  0x1a   :  { %142 = vmatpush.msra.mxu0 %v41_v37  ;;  %v230_v37 = vld [vmem:[%s938_s3 + $0x8] sm:$0xff] }
  0x1b   :  { %171 = vmatpush.msra.mxu1 %v57_v38  ;;  %239 = vperm.xlu1 %559, %v233_v50   ;;  %v318_v38 = vld [vmem:[%s936_s6 + $0x18] sm:$0xff] }
  0x1c   :  { %143 = vmatpush.msra.mxu0 %v40_v40  ;;  %v315_v40 = vld [vmem:[%s936_s6] sm:$0xff] }
  0x1d   :  { %172 = vmatpush.msra.mxu1 %v56_v41  ;;  %v232_v41 = vld [vmem:[%s938_s3 + $0x18] sm:$0xff] }
  0x1e   :  { %144 = vmatpush.msra.mxu0 %v39_v43  ;;  %249 = vperm.xlu2 %560, %v235_v36  }
  0x1f   :  { %173 = vmatpush.msra.mxu1 %v55_v44  ;;  %331 = vperm.xlu0 %558, %v317_v49  }
  0x20   :  { %145 = vmatpush.msra.mxu0 %v38_v45 }
  0x21   :  { %174 = vmatpush.msra.mxu1 %v54_v46  ;;  %146 = vmatmul.f32.vlgmr.msra.gmra.mxu0 %v77_v47 }
  0x22   :  { %175 = vmatmul.f32.vlgmr.msra.gmra.mxu1 %v78_v48  ;;  %545 = vmatmul.msk.f32.gmra.mxu2 %vm113_vm1, %v85_v51 }
  0x23   :  { %326 = vperm.xlu1 %559, %v316_v55  }
  0x26   :  { %336 = vperm.xlu2 %560, %v318_v38  }
  0x27   :  { %403 = vperm.xlu0 %558, %v395_v54  }
  0x29   :  { %149 = vmatmul.f32.gmra.mxu0 %v80_v52 }
  0x2a   :  { %178 = vmatmul.f32.gmra.mxu1 %v81_v53  ;;  %546 = vmatmul.msk.f32.gmra.mxu2 %vm113_vm1, %v88_v56 }
  0x2e   :  { %321 = vperm.xlu2 %560, %v315_v40   ;;  %v438_v40 = vld [vmem:[%s941_s9] sm:$0x3] }
  0x2f   :  { %398 = vperm.xlu0 %558, %v394_v59  }
  0x31   :  { %152 = vmatmul.f32.gmra.mxu0 %v83_v57 }
  0x32   :  { %181 = vmatmul.f32.gmra.mxu1 %v84_v58 }
  0x39   :  { %155 = vmatmul.f32.gmra.mxu0 %v86_v60 }
  0x3a   :  { %184 = vmatmul.f32.gmra.mxu1 %v87_v61  ;;  %v311_v61 = vld [vmem:[%s939_s5] sm:$0xff] }
  0x70   :  { %v255_v44 = vpop.permute.xlu2 %254 }
  0x78   :  { %v250_v46 = vpop.permute.xlu2 %249 }
  0x79   :  { %v111_v2 = vpop.permute.xlu0 %110 }
  0x7d   :  { %v101_v5 = vpop.permute.xlu1 %100 }
  0x81   :  { %v106_v9 = vpop.permute.xlu0 %105 }
  0x85   :  { %v96_v11 = vpop.permute.xlu1 %95 }
  0x89   :  { %v245_v48 = vpop.permute.xlu0 %244 }
  0x8d   :  { %v240_v52 = vpop.permute.xlu1 %239 }
  0x94   :  { %v205_v62 = vpop.f32.mrf.mxu2 }
  0x9c   :  { %v208_v1 = vpop.f32.mrf.mxu2 }
  0x9e   :  { %v147_v63 = vpop.f32.mrf.mxu0 }
  0x9f   :  { %v176_v0 = vpop.f32.mrf.mxu1  ;;  %v148_v13 = vadd.f32 %v147_v63, %v96_v11  ;;  %v312_v63 = vld [vmem:[%s939_s5 + $0x8] sm:$0xff] }
  0xa1   :  { %v177_v20 = vadd.f32 %v176_v0, %v148_v13  ;;  %v313_v0 = vld [vmem:[%s939_s5 + $0x10] sm:$0xff] }
  0xa3   :  { %v206_v25 = vadd.f32 %v205_v62, %v177_v20 }
  0xa5   :  { %v211_v6 = vpop.f32.mrf.mxu2  ;;  %v221_v32 = vmul.f32 0.2, %v206_v25  ;;  %vm217_vm5 = vcmp.gt.f32.partialorder %v206_v25, 0.0 }
  0xa6   :  { %v150_v3 = vpop.f32.mrf.mxu0 }
  0xa7   :  { %v179_v4 = vpop.f32.mrf.mxu1  ;;  %v151_v12 = vadd.f32 %v150_v3, %v101_v5  ;;  %v225_v35 = vsel %vm217_vm5, %v206_v25, %v221_v32  ;;  %v440_v25 = vld [vmem:[%s941_s9 + $0x2] sm:$0x3] }
  0xa9   :  { %v180_v17 = vadd.f32 %v179_v4, %v151_v12  ;;  %v337_v4 = vpop.permute.xlu2 %336 }
  0xab   :  { %v209_v23 = vadd.f32 %v208_v1, %v180_v17  ;;  %v314_v1 = vld [vmem:[%s939_s5 + $0x18] sm:$0xff] }
  0xad   :  { %v214_v19 = vpop.f32.mrf.mxu2  ;;  %v222_v29 = vmul.f32 0.2, %v209_v23  ;;  %vm218_vm4 = vcmp.gt.f32.partialorder %v209_v23, 0.0 }
  0xae   :  { %v153_v7 = vpop.f32.mrf.mxu0 }
  0xaf   :  { %v182_v8 = vpop.f32.mrf.mxu1  ;;  %v154_v10 = vadd.f32 %v153_v7, %v106_v9  ;;  %v226_v33 = vsel %vm218_vm4, %v209_v23, %v222_v29  ;;  %v393_v23 = vld [vmem:[%s940_s7 + $0x8] sm:$0x1f]  ;;  %v500_v29 = vlaneseq }
  0xb1   :  { %v183_v14 = vadd.f32 %v182_v8, %v154_v10  ;;  %v327_v8 = vpop.permute.xlu1 %326  ;;  %v322_v12 = vpop.permute.xlu2 %321 }
  0xb3   :  { %v212_v21 = vadd.f32 %v211_v6, %v183_v14  ;;  %v332_v6 = vpop.permute.xlu0 %331 }
  0xb5   :  { %v223_v27 = vmul.f32 0.2, %v212_v21  ;;  %vm219_vm3 = vcmp.gt.f32.partialorder %v212_v21, 0.0 }
  0xb6   :  { %v156_v15 = vpop.f32.mrf.mxu0 }
  0xb7   :  { %v185_v16 = vpop.f32.mrf.mxu1  ;;  %v157_v18 = vadd.f32 %v156_v15, %v111_v2  ;;  %v227_v31 = vsel %vm219_vm3, %v212_v21, %v223_v27  ;;  %v392_v21 = vld [vmem:[%s940_s7] sm:$0xff] }
  0xb9   :  { %v186_v22 = vadd.f32 %v185_v16, %v157_v18 }
  0xbb   :  { %v215_v24 = vadd.f32 %v214_v19, %v186_v22 }
  0xbd   :  { %vm220_vm2 = vcmp.gt.f32.partialorder %v215_v24, 0.0  ;;  %v224_v26 = vmul.f32 0.2, %v215_v24 }
  0xbf   :  { %v228_v28 = vsel %vm220_vm2, %v215_v24, %v224_v26  ;;  %v404_v24 = vpop.permute.xlu0 %403  ;;  %v442_v26 = vrot.slane %v440_v25, 6  ;;  %vm506_vm2 = vcmask 1044484  }
  0xc0   :  { %282 = vmatpush.msra.mxu3 %v228_v28 }
  0xc2   :  { %283 = vmatpush.msra.mxu3 %v227_v31 }
  0xc4   :  { %284 = vmatpush.msra.mxu3 %v226_v33  ;;  %v882_v33 = vand.u32 127, %v500_v29 }
  0xc6   :  { %285 = vmatpush.msra.mxu3 %v225_v35  ;;  %v436_v35 = vld [vmem:[%s942_s10] sm:$0x3]  ;;  %vm520_vm0 = vcmp.ge.s32.totalorder %v882_v33, 64  ;;  %vm503_vm1 = vcmp.lt.s32.totalorder %v882_v33, 64 }
  0xc7   :  { %547 = vmatmul.msk.f32.vlgmr.msra.gmra.mxu3 %vm257_vm6, %v229_v34  ;;  %v399_v27 = vpop.permute.xlu0 %398 }
  0xcf   :  { %548 = vmatmul.msk.f32.gmra.mxu3 %vm257_vm6, %v230_v37 }
  0xd7   :  { %549 = vmatmul.msk.f32.gmra.mxu3 %vm257_vm6, %v231_v39 }
  0xdf   :  { %550 = vmatmul.msk.f32.gmra.mxu3 %vm257_vm6, %v232_v41 }
 0x14a   :  { %v287_v42 = vpop.f32.mrf.mxu3 }
 0x14b   :  { %v288_v53 = vadd.f32 %v287_v42, %v240_v52 }
 0x14d   :  { %v303_v59 = vmul.f32 0.2, %v288_v53  ;;  %vm299_vm10 = vcmp.gt.f32.partialorder %v288_v53, 0.0 }
 0x14f   :  { %v307_v62 = vsel %vm299_vm10, %v288_v53, %v303_v59 }
 0x152   :  { %v290_v43 = vpop.f32.mrf.mxu3 }
 0x153   :  { %v291_v50 = vadd.f32 %v290_v43, %v245_v48 }
 0x155   :  { %v304_v57 = vmul.f32 0.2, %v291_v50  ;;  %vm300_vm9 = vcmp.gt.f32.partialorder %v291_v50, 0.0 }
 0x157   :  { %v308_v60 = vsel %vm300_vm9, %v291_v50, %v304_v57 }
 0x15a   :  { %v293_v45 = vpop.f32.mrf.mxu3 }
 0x15b   :  { %v294_v47 = vadd.f32 %v293_v45, %v250_v46 }
 0x15d   :  { %v305_v55 = vmul.f32 0.2, %v294_v47  ;;  %vm301_vm8 = vcmp.gt.f32.partialorder %v294_v47, 0.0 }
 0x15f   :  { %v309_v58 = vsel %vm301_vm8, %v294_v47, %v305_v55 }
 0x162   :  { %v296_v49 = vpop.f32.mrf.mxu3 }
 0x163   :  { %v297_v51 = vadd.f32 %v296_v49, %v255_v44 }
 0x165   :  { %vm302_vm7 = vcmp.gt.f32.partialorder %v297_v51, 0.0  ;;  %v306_v54 = vmul.f32 0.2, %v297_v51 }
 0x167   :  { %v310_v56 = vsel %vm302_vm7, %v297_v51, %v306_v54 }
 0x168   :  { %363 = vmatpush.msrb.mxu3 %v310_v56 }
 0x16a   :  { %364 = vmatpush.msrb.mxu3 %v309_v58 }
 0x16c   :  { %365 = vmatpush.msrb.mxu3 %v308_v60 }
 0x16e   :  { %366 = vmatpush.msrb.mxu3 %v307_v62 }
 0x16f   :  { %551 = vmatmul.msk.f32.vlgmr.msrb.gmra.mxu3 %vm257_vm6, %v311_v61 }
 0x177   :  { %552 = vmatmul.msk.f32.gmra.mxu3 %vm257_vm6, %v312_v63 }
 0x17f   :  { %553 = vmatmul.msk.f32.gmra.mxu3 %vm257_vm6, %v313_v0 }
 0x187   :  { %554 = vmatmul.msk.f32.gmra.mxu3 %vm257_vm6, %v314_v1 }
 0x1f2   :  { %v368_v2 = vpop.f32.mrf.mxu3 }
 0x1f3   :  { %v369_v13 = vadd.f32 %v368_v2, %v322_v12 }
 0x1f5   :  { %v384_v19 = vmul.f32 0.2, %v369_v13  ;;  %vm380_vm14 = vcmp.gt.f32.partialorder %v369_v13, 0.0 }
 0x1f7   :  { %v388_v22 = vsel %vm380_vm14, %v369_v13, %v384_v19 }
 0x1fa   :  { %v371_v3 = vpop.f32.mrf.mxu3 }
 0x1fb   :  { %v372_v10 = vadd.f32 %v371_v3, %v327_v8 }
 0x1fd   :  { %v385_v17 = vmul.f32 0.2, %v372_v10  ;;  %vm381_vm13 = vcmp.gt.f32.partialorder %v372_v10, 0.0 }
 0x1ff   :  { %v389_v20 = vsel %vm381_vm13, %v372_v10, %v385_v17 }
 0x202   :  { %v374_v5 = vpop.f32.mrf.mxu3 }
 0x203   :  { %v375_v7 = vadd.f32 %v374_v5, %v332_v6 }
 0x205   :  { %v386_v15 = vmul.f32 0.2, %v375_v7  ;;  %vm382_vm12 = vcmp.gt.f32.partialorder %v375_v7, 0.0 }
 0x207   :  { %v390_v18 = vsel %vm382_vm12, %v375_v7, %v386_v15 }
 0x20a   :  { %v377_v9 = vpop.f32.mrf.mxu3 }
 0x20b   :  { %v378_v11 = vadd.f32 %v377_v9, %v337_v4 }
 0x20d   :  { %vm383_vm11 = vcmp.gt.f32.partialorder %v378_v11, 0.0  ;;  %v387_v14 = vmul.f32 0.2, %v378_v11 }
 0x20f   :  { %v391_v16 = vsel %vm383_vm11, %v378_v11, %v387_v14 }
 0x210   :  { %424 = vmatpush.msrb.mxu2 %v391_v16 }
 0x212   :  { %425 = vmatpush.msrb.mxu2 %v390_v18 }
 0x214   :  { %426 = vmatpush.msrb.mxu2 %v389_v20 }
 0x216   :  { %427 = vmatpush.msrb.mxu2 %v388_v22 }
 0x217   :  { %555 = vmatmul.msk.f32.vlgmr.msrb.gmra.mxu2 %vm257_vm6, %v392_v21 }
 0x21f   :  { %556 = vmatmul.msk.f32.gmra.mxu2 %vm257_vm6, %v393_v23 }
 0x29a   :  { %v429_v28 = vpop.f32.mrf.mxu2 }
 0x29b   :  { %v430_v30 = vadd.f32 %v429_v28, %v399_v27 }
 0x29d   :  { %561 = vtanh.f32 %v430_v30  ;;  %v444_v31 = vadd.f32 %v442_v26, %v430_v30  ;;  %v456_v32 = vand.u32 2147483647, %v430_v30  ;;  %v455_v5 = vmax.f32 %v430_v30, 0.0 }
 0x29f   :  { %v457_v34 = vsub.f32 0.0, %v456_v32  ;;  %v445_v36 = vmul.f32 0.5, %v444_v31  ;;  %v453_v59 = vmax.f32 %v444_v31, 1e-12 }
 0x2a1   :  { %v458_v37 = vmul.f32 1.442695, %v457_v34  ;;  %v447_v43 = vrot.slane %v445_v36, 2  ;;  %v454_v1 = vmul.f32 0.1, %v453_v59 }
 0x2a2   :  { %v432_v38 = vpop.f32.mrf.mxu2 }
 0x2a3   :  { %v562_v39 = vpop.eup %561  ;;  %563 = vpow2.f32 %v458_v37  ;;  %v892_v41 = vadd.f32 %v432_v38, %v404_v24  ;;  %v471_v9 = vrot.slane %v454_v1, 6  ;;  %v475_v10 = vrot.slane %v454_v1, 4 }
 0x2a4   :  { %v437_v42 = vmul.f32 %v562_v39, %v436_v35 }
 0x2a5   :  { %v480_v44 = vsel %vm479_vm15, %v892_v41, -inf  ;;  %v523_v45 = vsel %vm520_vm0, %v892_v41, -1e+30  ;;  %v505_v46 = vsel %vm503_vm1, %v892_v41, -1e+30 }
 0x2a6   :  { %v439_v47 = vadd.f32 %v438_v40, %v437_v42  ;;  %v481_v48 = vrot.slane %v480_v44, 4  ;;  %v524_v49 = vsel %vm506_vm2, %v523_v45, -inf  ;;  %v507_v50 = vsel %vm506_vm2, %v505_v46, -inf }
 0x2a7   :  { %525 = vmax.xlane.f32.xlu2 %v524_v49  ;;  %508 = vmax.xlane.f32.xlu1 %v507_v50 }
 0x2a8   :  { %v449_v51 = vsub.f32 %v439_v47, %v447_v43  ;;  %v451_v52 = vadd.f32 %v447_v43, %v439_v47  ;;  %v482_v53 = vmax.f32 %v480_v44, %v481_v48 }
 0x2a9   :  { %v564_v54 = vpop.eup %563 }
 0x2aa   :  { %450 = vst [vmem:[%s943_s11] sm:$0x3] %v449_v51  ;;  %v460_v55 = vadd.f32 1.0, %v564_v54  ;;  %v483_v56 = vrot.slane %v482_v53, 2  ;;  %v463_v57 = vmul.f32 -0.5, %v564_v54  ;;  %v466_v62 = vand.u32 2147483647, %v564_v54 }
 0x2ab   :  { %452 = vst [vmem:[%s943_s11 + $0x2] sm:$0x3] %v451_v52 }
 0x2ac   :  { %565 = vlog2.f32 %v460_v55  ;;  %v484_v58 = vmax.f32 %v482_v53, %v483_v56  ;;  %v464_v61 = vadd.f32 1.0, %v463_v57  ;;  %vm467_vm3 = vcmp.lt.f32.partialorder %v466_v62, 0.0004427343 }
 0x2ae   :  { %v485_v60 = vrot.slane %v484_v58, 1  ;;  %v465_v4 = vmul.f32 %v564_v54, %v464_v61 }
 0x2b0   :  { %v486_v63 = vmax.f32 %v484_v58, %v485_v60 }
 0x2b2   :  { %v566_v0 = vpop.eup %565  ;;  %v487_v2 = vsub.f32 %v892_v41, %v486_v63 }
 0x2b3   :  { %v462_v3 = vmul.f32 0.6931472, %v566_v0 }
 0x2b4   :  { %v488_v6 = vmul.f32 1.442695, %v487_v2 }
 0x2b5   :  { %v468_v7 = vsel %vm467_vm3, %v465_v4, %v462_v3 }
 0x2b6   :  { %v469_v8 = vadd.f32 %v468_v7, %v455_v5  ;;  %567 = vpow2.f32 %v488_v6 }
 0x2b8   :  { %v473_v11 = vadd.f32 %v471_v9, %v469_v8  ;;  %v477_v12 = vadd.f32 %v475_v10, %v469_v8 }
 0x2ba   :  { %474 = vst [vmem:[%s943_s11] sm:$0x30] %v473_v11 }
 0x2bb   :  { %478 = vst [vmem:[%s943_s11] sm:$0xc0] %v477_v12 }
 0x2bc   :  { %v568_v13 = vpop.eup %567 }
 0x2bd   :  { %v490_v14 = vsel %vm479_vm15, %v568_v13, 0.0 }
 0x2be   :  { %v491_v15 = vrot.slane %v490_v14, 4 }
 0x2c0   :  { %v492_v16 = vadd.f32 %v491_v15, %v490_v14 }
 0x2c2   :  { %v493_v17 = vrot.slane %v492_v16, 2 }
 0x2c4   :  { %v494_v18 = vadd.f32 %v493_v17, %v492_v16 }
 0x2c6   :  { %v495_v19 = vrot.slane %v494_v18, 1 }
 0x2c8   :  { %v496_v20 = vadd.f32 %v495_v19, %v494_v18 }
 0x2ca   :  { %569 = vrcp.f32 %v496_v20 }
 0x2d0   :  { %v570_v21 = vpop.eup %569 }
 0x2d1   :  { %v498_v22 = vmul.f32 %v570_v21, %v568_v13 }
 0x2d3   :  { %499 = vst [vmem:[%s943_s11 + $0x8] sm:$0xf] %v498_v22 }
 0x31a   :  { %v526_v23 = vpop.xlane.xlu2 %525  ;;  %v509_v24 = vpop.xlane.xlu1 %508 }
 0x31b   :  { %v527_v25 = vsub.f32 %v892_v41, %v526_v23  ;;  %v510_v26 = vsub.f32 %v892_v41, %v509_v24 }
 0x31d   :  { %v528_v27 = vmul.f32 1.442695, %v527_v25  ;;  %v511_v28 = vmul.f32 1.442695, %v510_v26 }
 0x31f   :  { %571 = vpow2.f32 %v528_v27 }
 0x320   :  { %573 = vpow2.f32 %v511_v28 }
 0x325   :  { %v572_v29 = vpop.eup %571 }
 0x326   :  { %v574_v30 = vpop.eup %573  ;;  %v530_v31 = vsel %vm520_vm0, %v572_v29, 0.0 }
 0x327   :  { %v531_v32 = vsel %vm506_vm2, %v530_v31, 0.0  ;;  %v513_v34 = vsel %vm503_vm1, %v574_v30, 0.0 }
 0x328   :  { %532 = vadd.xlane.f32.xlu2 %v531_v32  ;;  %v514_v35 = vsel %vm506_vm2, %v513_v34, 0.0 }
 0x329   :  { %515 = vadd.xlane.f32.xlu0 %v514_v35 }
 0x39b   :  { %v533_v36 = vpop.xlane.xlu2 %532 }
 0x39c   :  { %575 = vrcp.f32 %v533_v36  ;;  %v516_v37 = vpop.xlane.xlu0 %515 }
 0x39d   :  { %577 = vrcp.f32 %v516_v37 }
 0x3a2   :  { %v576_v38 = vpop.eup %575 }
 0x3a3   :  { %v578_v39 = vpop.eup %577  ;;  %v535_v40 = vmul.f32 %v576_v38, %v530_v31 }
 0x3a4   :  { %v518_v41 = vmul.f32 %v578_v39, %v513_v34 }
 0x3a6   :  { %v536_v42 = vadd.f32 %v535_v40, %v518_v41 }
 0x3a8   :  { %537 = vst [vmem:[%s943_s11 + $0x8] sm:$0x10] %v536_v42 }

</bundles_post_ra>
